<compile_context>
chip_gen: v6e
topology: v6e:2x2x1
jax: 0.10.0
libtpu: 0.0.40
codegen_flags: <defaults>
</compile_context>

<pallas_src>
import functools

import jax
import jax.numpy as jnp
from jax.experimental import pallas as pl
from jax.experimental.pallas import tpu as pltpu


def _shared_block_gru_kernel(x_ref, h_ref, wih_ref, whh_ref, bih_ref, bhh_ref,
                             wread_ref, wwbd_ref, g_ref, hnext_ref, att_ref,
                             *, hidden_size, n_templates):
    H = hidden_size
    T = n_templates
    TH = T * H
    K = wread_ref.shape[1]                      # write/read key width (=16)

    x = x_ref[...]                              # (Mb, I)  f32
    h = h_ref[...]                              # (Mb, H)  f32

    # ---- all T GRU cells in two lane-dense MXU matmuls (bf16 in, f32 acc) ----
    xb = x.astype(jnp.bfloat16)
    hb = h.astype(jnp.bfloat16)
    gi = jnp.dot(xb, wih_ref[...], preferred_element_type=jnp.float32) + bih_ref[...]
    gh = jnp.dot(hb, whh_ref[...], preferred_element_type=jnp.float32) + bhh_ref[...]

    # Column layout is gate-major: [ r (T*H) | z (T*H) | n (T*H) ], each gate
    # block is template-blocked [t0 | t1 | ...] with H lanes per template.
    r = jax.nn.sigmoid(gi[:, 0:TH] + gh[:, 0:TH])
    z = jax.nn.sigmoid(gi[:, TH:2 * TH] + gh[:, TH:2 * TH])
    n = jnp.tanh(gi[:, 2 * TH:3 * TH] + r * gh[:, 2 * TH:3 * TH])
    h_rep = jnp.concatenate([h] * T, axis=1)                  # (Mb, T*H) = [h|h|...]
    hs = (1.0 - z) * n + z * h_rep                            # per-template h_next

    # ---- template attention (gumbel-softmax, hard=True forward value) ----
    h_read = jnp.dot(h, wread_ref[...], preferred_element_type=jnp.float32)   # (Mb, K)
    # block-diagonal W_write -> all T write keys in one matmul: (Mb, T*K)
    wk = jnp.dot(hs, wwbd_ref[...], preferred_element_type=jnp.float32)

    logit_cols = []
    for t in range(T):
        wk_t = wk[:, t * K:(t + 1) * K]                       # (Mb, K)
        logit_cols.append(jnp.sum(wk_t * h_read, axis=1, keepdims=True))
    logits = jnp.concatenate(logit_cols, axis=1)              # (Mb, T)

    noisy = logits + g_ref[...]                               # gumbel-perturbed logits
    # hard one-hot (ties have probability ~0 with continuous gumbel noise)
    att = (noisy >= jnp.max(noisy, axis=1, keepdims=True)).astype(jnp.float32)
    att_ref[...] = att

    # ---- select the chosen template's hidden state per row ----
    hsel = att[:, 0:1] * hs[:, 0:H]
    for t in range(1, T):
        hsel = hsel + att[:, t:t + 1] * hs[:, t * H:(t + 1) * H]
    hnext_ref[...] = hsel


def prepare_kernel_params(w_ih, w_hh, b_ih, b_hh, w_read, w_write):
    """One-time repack of PyTorch-layout parameters into the fused kernel layout.

    PyTorch layout:
      w_ih  (T, 3H, I)   w_hh  (T, 3H, H)   b_ih/b_hh (T, 3H)   gate order r,z,n
      w_read (1, H, K)   w_write (T, H, K)
    Kernel layout (gate-major, template-blocked columns):
      Wih (I, 3*T*H) bf16, Whh (H, 3*T*H) bf16, biases (1, 3*T*H) f32,
      W_read (H, K) f32, W_write block-diagonal (T*H, T*K) f32.
    """
    T, threeH, I = w_ih.shape
    H = threeH // 3
    K = w_write.shape[2]
    TH = T * H

    wih_f = jnp.transpose(w_ih.reshape(T, 3, H, I), (3, 1, 0, 2)).reshape(I, 3 * TH)
    whh_f = jnp.transpose(w_hh.reshape(T, 3, H, H), (3, 1, 0, 2)).reshape(H, 3 * TH)
    bih_f = jnp.transpose(b_ih.reshape(T, 3, H), (1, 0, 2)).reshape(1, 3 * TH)
    bhh_f = jnp.transpose(b_hh.reshape(T, 3, H), (1, 0, 2)).reshape(1, 3 * TH)

    wwbd = jnp.zeros((TH, T * K), jnp.float32)
    for t in range(T):
        wwbd = wwbd.at[t * H:(t + 1) * H, t * K:(t + 1) * K].set(w_write[t])

    return (wih_f.astype(jnp.bfloat16), whh_f.astype(jnp.bfloat16),
            bih_f.astype(jnp.float32), bhh_f.astype(jnp.float32),
            w_read[0].astype(jnp.float32), wwbd.astype(jnp.float32))


def shared_block_gru_forward(inputs, hidden, kparams, gumbel, num_hidden,
                             row_block=None):
    """inputs (N, num_hidden*I), hidden (N, num_hidden*H)
       -> hnext (N, num_hidden*H), att (N, num_hidden, T)."""
    wih_f, whh_f, bih_f, bhh_f, w_read2d, wwbd = kparams
    N = inputs.shape[0]
    I = inputs.shape[1] // num_hidden
    H = hidden.shape[1] // num_hidden
    T = gumbel.shape[-1]
    K = w_read2d.shape[1]
    TH = T * H
    M = N * num_hidden

    # Contiguous reshapes only (metadata) -- no activation transposes.
    x = inputs.reshape(M, I)
    h = hidden.reshape(M, H)
    g = gumbel.reshape(M, T)

    if row_block is None:
        row_block = M                      # single grid step at small sizes
    assert M % row_block == 0
    grid = (M // row_block,)

    kernel = functools.partial(_shared_block_gru_kernel,
                               hidden_size=H, n_templates=T)

    hnext, att = pl.pallas_call(
        kernel,
        out_shape=(jax.ShapeDtypeStruct((M, H), jnp.float32),
                   jax.ShapeDtypeStruct((M, T), jnp.float32)),
        grid_spec=pltpu.PrefetchScalarGridSpec(
            num_scalar_prefetch=0,
            grid=grid,
            in_specs=[
                pl.BlockSpec((row_block, I), lambda i: (i, 0)),    # x
                pl.BlockSpec((row_block, H), lambda i: (i, 0)),    # h
                pl.BlockSpec((I, 3 * TH), lambda i: (0, 0)),       # W_ih (resident)
                pl.BlockSpec((H, 3 * TH), lambda i: (0, 0)),       # W_hh (resident)
                pl.BlockSpec((1, 3 * TH), lambda i: (0, 0)),       # b_ih (resident)
                pl.BlockSpec((1, 3 * TH), lambda i: (0, 0)),       # b_hh (resident)
                pl.BlockSpec((H, K), lambda i: (0, 0)),            # W_read (resident)
                pl.BlockSpec((TH, T * K), lambda i: (0, 0)),       # W_write blkdiag
                pl.BlockSpec((row_block, T), lambda i: (i, 0)),    # gumbel noise
            ],
            out_specs=[
                pl.BlockSpec((row_block, H), lambda i: (i, 0)),    # hnext
                pl.BlockSpec((row_block, T), lambda i: (i, 0)),    # att (one-hot)
            ],
        ),
        compiler_params=pltpu.CompilerParams(
            dimension_semantics=("parallel",)),
    )(x, h, wih_f, whh_f, bih_f, bhh_f, w_read2d, wwbd, g)

    return hnext.reshape(N, num_hidden * H), att.reshape(N, num_hidden, T)


def shared_block_gru_reference(inputs, hidden, torch_params, gumbel, num_hidden):
    """Pure-JAX reference with PyTorch SharedBlockGRU semantics (same bf16
    casts for the GRU matmuls as the kernel so comparisons are tight)."""
    w_ih, w_hh, b_ih, b_hh, w_read, w_write = torch_params
    N = inputs.shape[0]
    T, threeH, I = w_ih.shape
    H = threeH // 3
    M = N * num_hidden

    x = inputs.reshape(M, I)
    h = hidden.reshape(M, H)
    xb = x.astype(jnp.bfloat16)
    hb = h.astype(jnp.bfloat16)

    gi = jnp.einsum('mi,tgi->tmg', xb, w_ih.astype(jnp.bfloat16),
                    preferred_element_type=jnp.float32) + b_ih[:, None, :]
    gh = jnp.einsum('mh,tgh->tmg', hb, w_hh.astype(jnp.bfloat16),
                    preferred_element_type=jnp.float32) + b_hh[:, None, :]
    r = jax.nn.sigmoid(gi[..., 0:H] + gh[..., 0:H])
    z = jax.nn.sigmoid(gi[..., H:2 * H] + gh[..., H:2 * H])
    n = jnp.tanh(gi[..., 2 * H:] + r * gh[..., 2 * H:])
    hs = (1.0 - z) * n + z * h[None]                     # (T, M, H)

    h_read = h @ w_read[0]                               # (M, K)
    wk = jnp.einsum('tmh,thk->tmk', hs, w_write)         # (T, M, K)
    logits = jnp.einsum('mk,tmk->mt', h_read, wk)        # (M, T)
    noisy = logits + gumbel.reshape(M, T)
    att = (noisy >= noisy.max(axis=-1, keepdims=True)).astype(jnp.float32)
    hnext = jnp.einsum('mt,tmh->mh', att, hs)
    return hnext.reshape(N, num_hidden * H), att.reshape(N, num_hidden, T)


if __name__ == "__main__":
    # Small shapes consistent with the module:
    # N=2 batch, num_hidden(k)=4 blocks, I=16 per-block input, H=32 per-block
    # hidden, T=4 templates  ->  ninp=64, nhid=128.
    N, num_hidden, T = 2, 4, 4
    I, H, K = 16, 32, 16
    ninp, nhid = num_hidden * I, num_hidden * H
    M = N * num_hidden

    key = jax.random.PRNGKey(0)
    ks = jax.random.split(key, 9)

    # nn.GRUCell init: U(-1/sqrt(H), 1/sqrt(H)); gate order r, z, n.
    bound = 1.0 / (H ** 0.5)
    w_ih = jax.random.uniform(ks[0], (T, 3 * H, I), jnp.float32, -bound, bound)
    w_hh = jax.random.uniform(ks[1], (T, 3 * H, H), jnp.float32, -bound, bound)
    b_ih = jax.random.uniform(ks[2], (T, 3 * H), jnp.float32, -bound, bound)
    b_hh = jax.random.uniform(ks[3], (T, 3 * H), jnp.float32, -bound, bound)
    # GroupLinearLayer weights: 0.01 * randn, no bias.
    w_read = 0.01 * jax.random.normal(ks[4], (1, H, K), jnp.float32)
    w_write = 0.01 * jax.random.normal(ks[5], (T, H, K), jnp.float32)

    inputs = jax.random.normal(ks[6], (N, ninp), jnp.float32)
    hidden = jax.random.normal(ks[7], (N, nhid), jnp.float32)

    # Gumbel noise for the hard gumbel-softmax, sampled once so the kernel and
    # the reference share it (PyTorch samples it internally at forward time).
    u = jax.random.uniform(ks[8], (M, T), jnp.float32, 1e-6, 1.0 - 1e-6)
    gumbel = -jnp.log(-jnp.log(u))

    kparams = prepare_kernel_params(w_ih, w_hh, b_ih, b_hh, w_read, w_write)
    hnext, att = shared_block_gru_forward(inputs, hidden, kparams, gumbel, num_hidden)
    hnext = jax.block_until_ready(hnext)
    att = jax.block_until_ready(att)

    ref_h, ref_att = shared_block_gru_reference(
        inputs, hidden, (w_ih, w_hh, b_ih, b_hh, w_read, w_write), gumbel, num_hidden)

    assert hnext.shape == (N, nhid)
    assert att.shape == (N, num_hidden, T)
    assert jnp.allclose(att, ref_att), "attention one-hot mismatch vs reference"
    assert jnp.allclose(hnext, ref_h, atol=1e-3, rtol=1e-3), "hnext mismatch vs reference"

    print("KERNEL_OK")
</pallas_src>

<mosaic_0001>
module attributes {stable_mosaic.version = 11 : i64} {
  func.func @_shared_block_gru_kernel(%arg0: i32, %arg1: memref<8x16xf32, #tpu.memory_space<vmem>>, %arg2: memref<8x32xf32, #tpu.memory_space<vmem>>, %arg3: memref<16x384xbf16, #tpu.memory_space<vmem>>, %arg4: memref<32x384xbf16, #tpu.memory_space<vmem>>, %arg5: memref<1x384xf32, #tpu.memory_space<vmem>>, %arg6: memref<1x384xf32, #tpu.memory_space<vmem>>, %arg7: memref<32x16xf32, #tpu.memory_space<vmem>>, %arg8: memref<128x64xf32, #tpu.memory_space<vmem>>, %arg9: memref<8x4xf32, #tpu.memory_space<vmem>>, %arg10: memref<8x32xf32, #tpu.memory_space<vmem>>, %arg11: memref<8x4xf32, #tpu.memory_space<vmem>>) attributes {dimension_semantics = [#tpu.dimension_semantics<parallel>], iteration_bounds = array<i64: 1>, scalar_prefetch = 0 : i64, scratch_operands = 0 : i64, tpu.core_type = #tpu.core_type<tc>, window_params = [{transform_indices = @transform_0, window_bounds = array<i64: 8, 16>}, {transform_indices = @transform_1, window_bounds = array<i64: 8, 32>}, {pipeline_mode = #tpu.pipeline_mode<synchronous>, transform_indices = @transform_2, window_bounds = array<i64: 16, 384>}, {pipeline_mode = #tpu.pipeline_mode<synchronous>, transform_indices = @transform_3, window_bounds = array<i64: 32, 384>}, {pipeline_mode = #tpu.pipeline_mode<synchronous>, transform_indices = @transform_4, window_bounds = array<i64: 1, 384>}, {pipeline_mode = #tpu.pipeline_mode<synchronous>, transform_indices = @transform_5, window_bounds = array<i64: 1, 384>}, {pipeline_mode = #tpu.pipeline_mode<synchronous>, transform_indices = @transform_6, window_bounds = array<i64: 32, 16>}, {pipeline_mode = #tpu.pipeline_mode<synchronous>, transform_indices = @transform_7, window_bounds = array<i64: 128, 64>}, {transform_indices = @transform_8, window_bounds = array<i64: 8, 4>}, {transform_indices = @transform_9, window_bounds = array<i64: 8, 32>}, {transform_indices = @transform_10, window_bounds = array<i64: 8, 4>}]} {
    %c0 = arith.constant 0 : index
    %c0_0 = arith.constant 0 : index
    %0 = vector.load %arg1[%c0, %c0_0] : memref<8x16xf32, #tpu.memory_space<vmem>>, vector<8x16xf32>
    %c0_1 = arith.constant 0 : index
    %c0_2 = arith.constant 0 : index
    %1 = vector.load %arg2[%c0_1, %c0_2] : memref<8x32xf32, #tpu.memory_space<vmem>>, vector<8x32xf32>
    %2 = arith.truncf %0 : vector<8x16xf32> to vector<8x16xbf16>
    %3 = arith.truncf %1 : vector<8x32xf32> to vector<8x32xbf16>
    %c0_3 = arith.constant 0 : index
    %c0_4 = arith.constant 0 : index
    %4 = vector.load %arg3[%c0_3, %c0_4] : memref<16x384xbf16, #tpu.memory_space<vmem>>, vector<16x384xbf16>
    %cst = arith.constant dense<0.000000e+00> : vector<8x384xf32>
    %5 = tpu.matmul %2, %4, %cst {dimension_numbers = #tpu.dot_dimension_numbers<[1], [0], [0], [1], [0, 0, 1, 1], [], []>} : vector<8x16xbf16>, vector<16x384xbf16>, vector<8x384xf32> -> vector<8x384xf32>
    %c0_5 = arith.constant 0 : index
    %c0_6 = arith.constant 0 : index
    %6 = vector.load %arg5[%c0_5, %c0_6] : memref<1x384xf32, #tpu.memory_space<vmem>>, vector<1x384xf32>
    %7 = vector.broadcast %6 : vector<1x384xf32> to vector<8x384xf32>
    %8 = arith.addf %5, %7 : vector<8x384xf32>
    %c0_7 = arith.constant 0 : index
    %c0_8 = arith.constant 0 : index
    %9 = vector.load %arg4[%c0_7, %c0_8] : memref<32x384xbf16, #tpu.memory_space<vmem>>, vector<32x384xbf16>
    %cst_9 = arith.constant dense<0.000000e+00> : vector<8x384xf32>
    %10 = tpu.matmul %3, %9, %cst_9 {dimension_numbers = #tpu.dot_dimension_numbers<[1], [0], [0], [1], [0, 0, 1, 1], [], []>} : vector<8x32xbf16>, vector<32x384xbf16>, vector<8x384xf32> -> vector<8x384xf32>
    %c0_10 = arith.constant 0 : index
    %c0_11 = arith.constant 0 : index
    %11 = vector.load %arg6[%c0_10, %c0_11] : memref<1x384xf32, #tpu.memory_space<vmem>>, vector<1x384xf32>
    %12 = vector.broadcast %11 : vector<1x384xf32> to vector<8x384xf32>
    %13 = arith.addf %10, %12 : vector<8x384xf32>
    %14 = vector.extract_strided_slice %8 {offsets = [0, 0], sizes = [8, 128], strides = [1, 1]} : vector<8x384xf32> to vector<8x128xf32>
    %15 = vector.extract_strided_slice %13 {offsets = [0, 0], sizes = [8, 128], strides = [1, 1]} : vector<8x384xf32> to vector<8x128xf32>
    %16 = arith.addf %14, %15 : vector<8x128xf32>
    %17 = arith.negf %16 : vector<8x128xf32>
    %18 = math.exp %17 : vector<8x128xf32>
    %cst_12 = arith.constant 1.000000e+00 : f32
    %19 = vector.broadcast %cst_12 : f32 to vector<8x128xf32>
    %20 = arith.addf %19, %18 : vector<8x128xf32>
    %21 = arith.divf %19, %20 : vector<8x128xf32>
    %22 = vector.extract_strided_slice %8 {offsets = [0, 128], sizes = [8, 128], strides = [1, 1]} : vector<8x384xf32> to vector<8x128xf32>
    %23 = vector.extract_strided_slice %13 {offsets = [0, 128], sizes = [8, 128], strides = [1, 1]} : vector<8x384xf32> to vector<8x128xf32>
    %24 = arith.addf %22, %23 : vector<8x128xf32>
    %25 = arith.negf %24 : vector<8x128xf32>
    %26 = math.exp %25 : vector<8x128xf32>
    %cst_13 = arith.constant 1.000000e+00 : f32
    %27 = vector.broadcast %cst_13 : f32 to vector<8x128xf32>
    %28 = arith.addf %27, %26 : vector<8x128xf32>
    %29 = arith.divf %27, %28 : vector<8x128xf32>
    %30 = vector.extract_strided_slice %8 {offsets = [0, 256], sizes = [8, 128], strides = [1, 1]} : vector<8x384xf32> to vector<8x128xf32>
    %31 = vector.extract_strided_slice %13 {offsets = [0, 256], sizes = [8, 128], strides = [1, 1]} : vector<8x384xf32> to vector<8x128xf32>
    %32 = arith.mulf %21, %31 : vector<8x128xf32>
    %33 = arith.addf %30, %32 : vector<8x128xf32>
    %34 = math.tanh %33 : vector<8x128xf32>
    %35 = tpu.concatenate %1, %1, %1, %1 in 1 : vector<8x32xf32>, vector<8x32xf32>, vector<8x32xf32>, vector<8x32xf32> -> vector<8x128xf32>
    %cst_14 = arith.constant 1.000000e+00 : f32
    %36 = vector.broadcast %cst_14 : f32 to vector<8x128xf32>
    %37 = arith.subf %36, %29 : vector<8x128xf32>
    %38 = arith.mulf %37, %34 : vector<8x128xf32>
    %39 = arith.mulf %29, %35 : vector<8x128xf32>
    %40 = arith.addf %38, %39 : vector<8x128xf32>
    %c0_15 = arith.constant 0 : index
    %c0_16 = arith.constant 0 : index
    %41 = vector.load %arg7[%c0_15, %c0_16] : memref<32x16xf32, #tpu.memory_space<vmem>>, vector<32x16xf32>
    %cst_17 = arith.constant dense<0.000000e+00> : vector<8x16xf32>
    %42 = tpu.matmul %1, %41, %cst_17 {dimension_numbers = #tpu.dot_dimension_numbers<[1], [0], [0], [1], [0, 0, 1, 1], [], []>} : vector<8x32xf32>, vector<32x16xf32>, vector<8x16xf32> -> vector<8x16xf32>
    %c0_18 = arith.constant 0 : index
    %c0_19 = arith.constant 0 : index
    %43 = vector.load %arg8[%c0_18, %c0_19] : memref<128x64xf32, #tpu.memory_space<vmem>>, vector<128x64xf32>
    %cst_20 = arith.constant dense<0.000000e+00> : vector<8x64xf32>
    %44 = tpu.matmul %40, %43, %cst_20 {dimension_numbers = #tpu.dot_dimension_numbers<[1], [0], [0], [1], [0, 0, 1, 1], [], []>} : vector<8x128xf32>, vector<128x64xf32>, vector<8x64xf32> -> vector<8x64xf32>
    %45 = vector.extract_strided_slice %44 {offsets = [0, 0], sizes = [8, 16], strides = [1, 1]} : vector<8x64xf32> to vector<8x16xf32>
    %46 = arith.mulf %45, %42 : vector<8x16xf32>
    %cst_21 = arith.constant dense<0.000000e+00> : vector<8xf32>
    %47 = vector.multi_reduction <add>, %46, %cst_21 [1] : vector<8x16xf32> to vector<8xf32>
    %48 = vector.shape_cast %47 : vector<8xf32> to vector<8x1xf32>
    %49 = vector.extract_strided_slice %44 {offsets = [0, 16], sizes = [8, 16], strides = [1, 1]} : vector<8x64xf32> to vector<8x16xf32>
    %50 = arith.mulf %49, %42 : vector<8x16xf32>
    %cst_22 = arith.constant dense<0.000000e+00> : vector<8xf32>
    %51 = vector.multi_reduction <add>, %50, %cst_22 [1] : vector<8x16xf32> to vector<8xf32>
    %52 = vector.shape_cast %51 : vector<8xf32> to vector<8x1xf32>
    %53 = vector.extract_strided_slice %44 {offsets = [0, 32], sizes = [8, 16], strides = [1, 1]} : vector<8x64xf32> to vector<8x16xf32>
    %54 = arith.mulf %53, %42 : vector<8x16xf32>
    %cst_23 = arith.constant dense<0.000000e+00> : vector<8xf32>
    %55 = vector.multi_reduction <add>, %54, %cst_23 [1] : vector<8x16xf32> to vector<8xf32>
    %56 = vector.shape_cast %55 : vector<8xf32> to vector<8x1xf32>
    %57 = vector.extract_strided_slice %44 {offsets = [0, 48], sizes = [8, 16], strides = [1, 1]} : vector<8x64xf32> to vector<8x16xf32>
    %58 = arith.mulf %57, %42 : vector<8x16xf32>
    %cst_24 = arith.constant dense<0.000000e+00> : vector<8xf32>
    %59 = vector.multi_reduction <add>, %58, %cst_24 [1] : vector<8x16xf32> to vector<8xf32>
    %60 = vector.shape_cast %59 : vector<8xf32> to vector<8x1xf32>
    %61 = tpu.concatenate %48, %52, %56, %60 in 1 : vector<8x1xf32>, vector<8x1xf32>, vector<8x1xf32>, vector<8x1xf32> -> vector<8x4xf32>
    %c0_25 = arith.constant 0 : index
    %c0_26 = arith.constant 0 : index
    %62 = vector.load %arg9[%c0_25, %c0_26] : memref<8x4xf32, #tpu.memory_space<vmem>>, vector<8x4xf32>
    %63 = arith.addf %61, %62 : vector<8x4xf32>
    %cst_27 = arith.constant dense<0xFF800000> : vector<8xf32>
    %64 = vector.multi_reduction <maximumf>, %63, %cst_27 [1] : vector<8x4xf32> to vector<8xf32>
    %65 = vector.shape_cast %64 : vector<8xf32> to vector<8x1xf32>
    %66 = vector.broadcast %65 : vector<8x1xf32> to vector<8x4xf32>
    %67 = arith.cmpf oge, %63, %66 : vector<8x4xf32>
    %68 = arith.extui %67 : vector<8x4xi1> to vector<8x4xi32>
    %69 = arith.sitofp %68 : vector<8x4xi32> to vector<8x4xf32>
    %c0_28 = arith.constant 0 : index
    %c0_29 = arith.constant 0 : index
    %70 = vector.load %arg11[%c0_28, %c0_29] : memref<8x4xf32, #tpu.memory_space<vmem>>, vector<8x4xf32>
    tpu.vector_store %arg11[%c0_28, %c0_29], %69 {strides = array<i32>} : memref<8x4xf32, #tpu.memory_space<vmem>>, vector<8x4xf32>,
    %71 = vector.extract_strided_slice %69 {offsets = [0, 0], sizes = [8, 1], strides = [1, 1]} : vector<8x4xf32> to vector<8x1xf32>
    %72 = vector.extract_strided_slice %40 {offsets = [0, 0], sizes = [8, 32], strides = [1, 1]} : vector<8x128xf32> to vector<8x32xf32>
    %73 = vector.broadcast %71 : vector<8x1xf32> to vector<8x32xf32>
    %74 = arith.mulf %73, %72 : vector<8x32xf32>
    %75 = vector.extract_strided_slice %69 {offsets = [0, 1], sizes = [8, 1], strides = [1, 1]} : vector<8x4xf32> to vector<8x1xf32>
    %76 = vector.extract_strided_slice %40 {offsets = [0, 32], sizes = [8, 32], strides = [1, 1]} : vector<8x128xf32> to vector<8x32xf32>
    %77 = vector.broadcast %75 : vector<8x1xf32> to vector<8x32xf32>
    %78 = arith.mulf %77, %76 : vector<8x32xf32>
    %79 = arith.addf %74, %78 : vector<8x32xf32>
    %80 = vector.extract_strided_slice %69 {offsets = [0, 2], sizes = [8, 1], strides = [1, 1]} : vector<8x4xf32> to vector<8x1xf32>
    %81 = vector.extract_strided_slice %40 {offsets = [0, 64], sizes = [8, 32], strides = [1, 1]} : vector<8x128xf32> to vector<8x32xf32>
    %82 = vector.broadcast %80 : vector<8x1xf32> to vector<8x32xf32>
    %83 = arith.mulf %82, %81 : vector<8x32xf32>
    %84 = arith.addf %79, %83 : vector<8x32xf32>
    %85 = vector.extract_strided_slice %69 {offsets = [0, 3], sizes = [8, 1], strides = [1, 1]} : vector<8x4xf32> to vector<8x1xf32>
    %86 = vector.extract_strided_slice %40 {offsets = [0, 96], sizes = [8, 32], strides = [1, 1]} : vector<8x128xf32> to vector<8x32xf32>
    %87 = vector.broadcast %85 : vector<8x1xf32> to vector<8x32xf32>
    %88 = arith.mulf %87, %86 : vector<8x32xf32>
    %89 = arith.addf %84, %88 : vector<8x32xf32>
    %c0_30 = arith.constant 0 : index
    %c0_31 = arith.constant 0 : index
    %90 = vector.load %arg10[%c0_30, %c0_31] : memref<8x32xf32, #tpu.memory_space<vmem>>, vector<8x32xf32>
    tpu.vector_store %arg10[%c0_30, %c0_31], %89 {strides = array<i32>} : memref<8x32xf32, #tpu.memory_space<vmem>>, vector<8x32xf32>,
    return
  }
  func.func @transform_0(%arg0: i32) -> (i32, i32) {
    %c0_i32 = arith.constant 0 : i32
    %c0_i32_0 = arith.constant 0 : i32
    return %arg0, %c0_i32 : i32, i32
  }
  func.func @transform_1(%arg0: i32) -> (i32, i32) {
    %c0_i32 = arith.constant 0 : i32
    %c0_i32_0 = arith.constant 0 : i32
    return %arg0, %c0_i32 : i32, i32
  }
  func.func @transform_2(%arg0: i32) -> (i32, i32) {
    %c0_i32 = arith.constant 0 : i32
    %c0_i32_0 = arith.constant 0 : i32
    %c0_i32_1 = arith.constant 0 : i32
    return %c0_i32, %c0_i32_0 : i32, i32
  }
  func.func @transform_3(%arg0: i32) -> (i32, i32) {
    %c0_i32 = arith.constant 0 : i32
    %c0_i32_0 = arith.constant 0 : i32
    %c0_i32_1 = arith.constant 0 : i32
    return %c0_i32, %c0_i32_0 : i32, i32
  }
  func.func @transform_4(%arg0: i32) -> (i32, i32) {
    %c0_i32 = arith.constant 0 : i32
    %c0_i32_0 = arith.constant 0 : i32
    %c0_i32_1 = arith.constant 0 : i32
    return %c0_i32, %c0_i32_0 : i32, i32
  }
  func.func @transform_5(%arg0: i32) -> (i32, i32) {
    %c0_i32 = arith.constant 0 : i32
    %c0_i32_0 = arith.constant 0 : i32
    %c0_i32_1 = arith.constant 0 : i32
    return %c0_i32, %c0_i32_0 : i32, i32
  }
  func.func @transform_6(%arg0: i32) -> (i32, i32) {
    %c0_i32 = arith.constant 0 : i32
    %c0_i32_0 = arith.constant 0 : i32
    %c0_i32_1 = arith.constant 0 : i32
    return %c0_i32, %c0_i32_0 : i32, i32
  }
  func.func @transform_7(%arg0: i32) -> (i32, i32) {
    %c0_i32 = arith.constant 0 : i32
    %c0_i32_0 = arith.constant 0 : i32
    %c0_i32_1 = arith.constant 0 : i32
    return %c0_i32, %c0_i32_0 : i32, i32
  }
  func.func @transform_8(%arg0: i32) -> (i32, i32) {
    %c0_i32 = arith.constant 0 : i32
    %c0_i32_0 = arith.constant 0 : i32
    return %arg0, %c0_i32 : i32, i32
  }
  func.func @transform_9(%arg0: i32) -> (i32, i32) {
    %c0_i32 = arith.constant 0 : i32
    %c0_i32_0 = arith.constant 0 : i32
    return %arg0, %c0_i32 : i32, i32
  }
  func.func @transform_10(%arg0: i32) -> (i32, i32) {
    %c0_i32 = arith.constant 0 : i32
    %c0_i32_0 = arith.constant 0 : i32
    return %arg0, %c0_i32 : i32, i32
  }
}

</mosaic_0001>

<bundles_post_ra>
// kernel: tpu_custom_call.1
= control target key start
LH: loop header
LB: loop body
LE: loop exit
PB: predicated region body
PF: predicated region fallthrough
CT: control target
= control target key end

     0   :  { %v778_v2 = vmov 0   ;;  %v779_v6 = vmov 0.0   ;;  %vm77_vm0 = vcmask 130048   ;;  %vm780_vm1 = vmmov 0   ;;  %s781_s26 = smov 32   ;;  %s782_s27 = smov 96   ;;  %s1025_s0 = inlined_call_operand.vmem [shape: f32[8,16], index: 0, kind: input, shape index: {}]   ;;  %s1026_s1 = inlined_call_operand.vmem [shape: f32[8,32], index: 1, kind: input, shape index: {}]   ;;  %s1027_s2 = inlined_call_operand.vmem [shape: bf16[16,384], index: 2, kind: input, shape index: {}]   ;;  %s1028_s3 = inlined_call_operand.vmem [shape: bf16[32,384], index: 3, kind: input, shape index: {}]   ;;  %s1029_s4 = inlined_call_operand.vmem [shape: f32[1,384], index: 4, kind: input, shape index: {}]   ;;  %s1030_s5 = inlined_call_operand.vmem [shape: f32[1,384], index: 5, kind: input, shape index: {}]   ;;  %s1031_s6 = inlined_call_operand.vmem [shape: f32[32,16], index: 6, kind: input, shape index: {}]   ;;  %s1032_s7 = inlined_call_operand.vmem [shape: f32[128,64], index: 7, kind: input, shape index: {}]   ;;  %s1033_s8 = inlined_call_operand.vmem [shape: f32[8,4], index: 8, kind: input, shape index: {}]   ;;  %s1034_s9 = inlined_call_operand.hbm [shape: f32[8,32], index: 9, kind: output, shape index: {0}]   ;;  %s1035_s10 = inlined_call_operand.vmem [shape: f32[8,4], index: 10, kind: output, shape index: {1}]  }
   0x1   :  { %v734_v0 = vld [vmem:[%s1027_s2 + $0x4] ss:$12 sps:$4 sm:$0xff]   ;;  %v736_v1 = vld [vmem:[%s1027_s2] ss:$12 sps:$4 sm:$0xff]   ;;  %113 = vmatprep.mubr.bf16.mxu0 %v778_v2  ;;  %v739_v5 = vld [vmem:[%s1028_s3 + $0x1c] ss:$12 sps:$4 sm:$0xff]   ;;  %655 = vmatprep.subr.bf16.mxu1 %v779_v6 }
   0x2   :  { %v36_v3 = vld [vmem:[%s1025_s0] sm:$0xff]  ;;  %95 = vmatprep.subr.bf16.mxu0 %v734_v0  ;;  %657 = vmatprep.mubr.msk.bf16.mxu1 %vm780_vm1, %v779_v6  ;;  %v745_v11 = vld [vmem:[%s1027_s2 + $0x8] ss:$12 sps:$4 sm:$0xff]   ;;  %s783_s11 = smov 64  }
   0x3   :  { %v38_v4 = vpack.c.bf16 %v36_v3, %v36_v3  ;;  %96 = vmatpush1.bf16.msra.mxu0 %v736_v1  ;;  %v737_v7 = vld [vmem:[%s1028_s3 + $0x18] ss:$12 sps:$4 sm:$0xff]   ;;  %v740_v10 = vld [vmem:[%s1028_s3] ss:$12 sps:$4 sm:$0xff]   ;;  %656 = vmatpush3.bf16.msra.mxu1 %v745_v11 }
   0x4   :  { %235 = vmatprep.subr.bf16.mxu0 %v739_v5  ;;  %v742_v8 = vld [vmem:[%s1028_s3 + $0x4] ss:$12 sps:$4 sm:$0xff]  }
   0x5   :  { %v872_v9 = vld [vmem:[%s1026_s1] sm:$0xff] }
   0x6   :  { %322 = vrot.lane.b32.xlu0 %v872_v9, %s781_s26  ;;  %614 = vmatmul.mubr.msk.bf16.vlgmr.msra.gmra.mxu0 %vm77_vm0, %v38_v4 }
   0x7   :  { %328 = vrot.lane.b32.xlu1 %v872_v9, %s782_s27  ;;  %236 = vmatpush1.bf16.msra.mxu0 %v737_v7 }
   0x8   :  { %255 = vmatprep.mubr.bf16.mxu0 %v778_v2  ;;  %237 = vmatprep.subr.bf16.mxu0 %v742_v8 }
   0xa   :  { %325 = vrot.lane.b32.xlu0 %v872_v9, %s783_s11 }
   0xb   :  { %16 = vsyncpa [#allocation3], 0  ;;  %v39_v12 = vpack.c.bf16 %v872_v9, %v872_v9  ;;  %680 = vmatprep.subr.mxu1 %v779_v6  ;;  %238 = vmatpush1.bf16.msra.mxu0 %v740_v10  ;;  %vm219_vm2 = vcmask 261120   ;;  %v743_v13 = vld [vmem:[%s1028_s3 + $0x20] ss:$12 sps:$4 sm:$0xff]   ;;  %v343_v15 = vld [vmem:[%s1031_s6 + $0x18] sm:$0xff]  ;;  %v46_v35 = vlaneseq }
   0xc   :  { %661 = vmatprep.subr.bf16.mxu0 %v779_v6  ;;  %658 = vmatmul.mubr.msk.bf16.vlgmr.msra.gmra.mxu1 %vm77_vm0, %v38_v4  ;;  %v744_v14 = vld [vmem:[%s1028_s3 + $0x8] ss:$12 sps:$4 sm:$0xff]   ;;  %v340_v18 = vld [vmem:[%s1031_s6] sm:$0xff]  ;;  %v431_v19 = vld [vmem:[%s1032_s7 + $0x78] sm:$0xff]  ;;  %vm332_vm3 = vcmask 523264   ;;  %vm334_vm4 = vcmask 785408  }
   0xd   :  { %712 = vmatprep.mubr.msk.f32.mxu1 %vm780_vm1, %v779_v6  ;;  %v342_v16 = vld [vmem:[%s1031_s6 + $0x10] sm:$0xff]  ;;  %v341_v17 = vld [vmem:[%s1031_s6 + $0x8] sm:$0xff]  ;;  %681 = vmatpush3.msra.mxu1 %v431_v19  ;;  %v428_v22 = vld [vmem:[%s1032_s7 + $0x60] sm:$0xff]  ;;  %v47_v36 = vshrl.u32 %v46_v35, 7  ;;  %s787_s15 = smov 80   ;;  %vm540_vm5 = vcmask 7168  }
   0xe   :  { %622 = vmatmul.mubr.msk.bf16.vlgmr.msra.gmra.mxu0 %vm219_vm2, %v39_v12  ;;  %682 = vmatprep.subr.mxu1 %v779_v6  ;;  %v430_v20 = vld [vmem:[%s1032_s7 + $0x70] sm:$0xff]  ;;  %v429_v21 = vld [vmem:[%s1032_s7 + $0x68] sm:$0xff]  ;;  %v427_v23 = vld [vmem:[%s1032_s7 + $0x58] sm:$0xff]  ;;  %vm542_vm6 = vcmask 15360   ;;  %vm544_vm7 = vcmask 23552   ;;  %vm548_vm8 = vcmask 31744  }
   0xf   :  { %662 = vmatpush3.bf16.msra.mxu0 %v743_v13  ;;  %665 = vmatprep.mubr.msk.bf16.mxu0 %vm780_vm1, %v779_v6  ;;  %v426_v24 = vld [vmem:[%s1032_s7 + $0x50] sm:$0xff]  ;;  %v425_v25 = vld [vmem:[%s1032_s7 + $0x48] sm:$0xff]  ;;  %v424_v26 = vld [vmem:[%s1032_s7 + $0x40] sm:$0xff]  ;;  %v48_v38 = vsub.s32 0, %v47_v36  ;;  %v52_v47 = vsub.s32 1, %v47_v36 }
  0x10   :  { %663 = vmatprep.subr.bf16.mxu0 %v779_v6  ;;  %683 = vmatpush3.msra.mxu1 %v430_v20  ;;  %v423_v27 = vld [vmem:[%s1032_s7 + $0x38] sm:$0xff]  ;;  %v422_v28 = vld [vmem:[%s1032_s7 + $0x30] sm:$0xff]  ;;  %v421_v29 = vld [vmem:[%s1032_s7 + $0x28] sm:$0xff] }
  0x11   :  { %684 = vmatprep.subr.mxu1 %v779_v6  ;;  %v420_v30 = vld [vmem:[%s1032_s7 + $0x20] sm:$0xff]  ;;  %v419_v31 = vld [vmem:[%s1032_s7 + $0x18] sm:$0xff]  ;;  %v418_v32 = vld [vmem:[%s1032_s7 + $0x10] sm:$0xff] }
  0x12   :  { %685 = vmatpush3.msra.mxu1 %v429_v21  ;;  %v417_v33 = vld [vmem:[%s1032_s7 + $0x8] sm:$0xff]  ;;  %v416_v34 = vld [vmem:[%s1032_s7] sm:$0xff]  ;;  %s786_s7 = smov 112  }
  0x13   :  { %664 = vmatpush3.bf16.msra.mxu0 %v744_v14  ;;  %686 = vmatprep.subr.mxu1 %v779_v6  ;;  %v44_v39 = vld [vmem:[%s1029_s4] sm:$0x7]  ;;  %s784_s4 = smov 16  }
  0x14   :  { %669 = vmatprep.subr.mxu0 %v779_v6  ;;  %687 = vmatpush3.msra.mxu1 %v428_v22  ;;  %v170_v41 = vld [vmem:[%s1030_s5] sm:$0x7]  ;;  %v49_v43 = vrot.slane %v44_v39, %v48_v38  ;;  %v53_v55 = vrot.slane %v44_v39, %v52_v47  ;;  %s785_s5 = smov 48  }
  0x15   :  { %688 = vmatprep.subr.mxu1 %v779_v6  ;;  %v175_v44 = vrot.slane %v170_v41, %v48_v38  ;;  %v179_v52 = vrot.slane %v170_v41, %v52_v47 }
  0x16   :  { %666 = vmatmul.mubr.msk.bf16.vlgmr.msra.gmra.mxu0 %vm219_vm2, %v39_v12  ;;  %689 = vmatpush3.msra.mxu1 %v427_v23  ;;  %v56_v12 = vsub.s32 2, %v47_v36 }
  0x17   :  { %670 = vmatpush3.msra.mxu0 %v343_v15  ;;  %677 = vmatprep.mubr.msk.f32.mxu0 %vm780_vm1, %v779_v6 }
  0x18   :  { %671 = vmatprep.subr.mxu0 %v779_v6  ;;  %690 = vmatprep.subr.mxu1 %v779_v6  ;;  %v183_v13 = vrot.slane %v170_v41, %v56_v12  ;;  %v57_v15 = vrot.slane %v44_v39, %v56_v12 }
  0x19   :  { %672 = vmatpush3.msra.mxu0 %v342_v16  ;;  %691 = vmatpush3.msra.mxu1 %v426_v24 }
  0x1a   :  { %673 = vmatprep.subr.mxu0 %v779_v6  ;;  %692 = vmatprep.subr.mxu1 %v779_v6 }
  0x1b   :  { %674 = vmatpush3.msra.mxu0 %v341_v17  ;;  %693 = vmatpush3.msra.mxu1 %v425_v25 }
  0x1c   :  { %675 = vmatprep.subr.mxu0 %v779_v6  ;;  %694 = vmatprep.subr.mxu1 %v779_v6 }
  0x1d   :  { %676 = vmatpush3.msra.mxu0 %v340_v18  ;;  %695 = vmatpush3.msra.mxu1 %v424_v26 }
  0x1e   :  { %678 = vmatmul.mubr.msk.f32.vlgmr.msra.gmra.mxu0 %vm219_vm2, %v872_v9  ;;  %696 = vmatprep.subr.mxu1 %v779_v6 }
  0x1f   :  { %697 = vmatpush3.msra.mxu1 %v423_v27 }
  0x20   :  { %698 = vmatprep.subr.mxu1 %v779_v6 }
  0x21   :  { %699 = vmatpush3.msra.mxu1 %v422_v28 }
  0x22   :  { %700 = vmatprep.subr.mxu1 %v779_v6 }
  0x23   :  { %701 = vmatpush3.msra.mxu1 %v421_v29 }
  0x24   :  { %702 = vmatprep.subr.mxu1 %v779_v6 }
  0x25   :  { %703 = vmatpush3.msra.mxu1 %v420_v30 }
  0x26   :  { %704 = vmatprep.subr.mxu1 %v779_v6 }
  0x27   :  { %705 = vmatpush3.msra.mxu1 %v419_v31 }
  0x28   :  { %706 = vmatprep.subr.mxu1 %v779_v6 }
  0x29   :  { %707 = vmatpush3.msra.mxu1 %v418_v32 }
  0x2a   :  { %708 = vmatprep.subr.mxu1 %v779_v6 }
  0x2b   :  { %709 = vmatpush3.msra.mxu1 %v417_v33 }
  0x2c   :  { %710 = vmatprep.subr.mxu1 %v779_v6 }
  0x2d   :  { %711 = vmatpush3.msra.mxu1 %v416_v34 }
  0x78   :  { %v323_v22 = vpop.permute.xlu0 %322 }
  0x79   :  { %v331_v23 = vsel %vm219_vm2, %v872_v9, %v323_v22  ;;  %v329_v26 = vpop.permute.xlu1 %328 }
  0x7c   :  { %v326_v24 = vpop.permute.xlu0 %325 }
  0x7d   :  { %v333_v25 = vsel %vm332_vm3, %v331_v23, %v326_v24 }
  0x7e   :  { %v335_v28 = vsel %vm334_vm4, %v333_v25, %v329_v26 }
  0xc6   :  { %v115_v37 = vpop.f32.mrf.mxu0 }
  0xc7   :  { %v116_v50 = vadd.f32 %v115_v37, %v49_v43 }
  0xc8   :  { %v117_v40 = vpop.f32.mrf.mxu0 }
  0xc9   :  { %v118_v62 = vadd.f32 %v117_v40, %v53_v55 }
  0xca   :  { %v119_v42 = vpop.f32.mrf.mxu0 }
  0xcc   :  { %v120_v45 = vpop.f32.mrf.mxu0  ;;  %v156_v46 = vpop.f32.mrf.mxu1 }
  0xcd   :  { %v157_v18 = vadd.f32 %v156_v46, %v57_v15 }
  0xce   :  { %v257_v48 = vpop.f32.mrf.mxu0  ;;  %v659_v49 = vpop.f32.mrf.mxu1 }
  0xcf   :  { %v258_v51 = vadd.f32 %v257_v48, %v175_v44 }
  0xd0   :  { %v259_v53 = vpop.f32.mrf.mxu0  ;;  %v159_v54 = vpop.f32.mrf.mxu1 }
  0xd1   :  { %v304_v56 = vadd.f32 %v258_v51, %v116_v50  ;;  %v260_v60 = vadd.f32 %v259_v53, %v179_v52  ;;  %v546_v54 = vld [vmem:[%s1033_s8] sm:$0xff]  ;;  %s791_s8 = smov [#allocation2]  }
  0xd2   :  { %v261_v57 = vpop.f32.mrf.mxu0  ;;  %v660_v58 = vpop.f32.mrf.mxu1 }
  0xd3   :  { %v624_v59 = vmul.f32 -1.442695, %v304_v56  ;;  %v311_v0 = vadd.f32 %v260_v60, %v118_v62  ;;  %v789_v60 = vmov 1  }
  0xd4   :  { %v262_v61 = vpop.f32.mrf.mxu0  ;;  %729 = vset.pattern.permute.xlu1 %v789_v60 }
  0xd5   :  { %746 = vpow2.f32 %v624_v59  ;;  %v625_v4 = vmul.f32 -1.442695, %v311_v0  ;;  %v788_v59 = vmov 2  }
  0xd6   :  { %v298_v63 = vpop.f32.mrf.mxu0  ;;  %730 = vset.pattern.permute.xlu0 %v788_v59 }
  0xd7   :  { %748 = vpow2.f32 %v625_v4  ;;  %v299_v17 = vadd.f32 %v298_v63, %v183_v13  ;;  %v790_v63 = vmov 3  }
  0xd8   :  { %v667_v1 = vpop.f32.mrf.mxu0 }
  0xda   :  { %v301_v3 = vpop.f32.mrf.mxu0 }
  0xdc   :  { %v668_v5 = vpop.f32.mrf.mxu0 }
  0xde   :  { %v412_v7 = vpop.f32.mrf.mxu0 }
  0xdf   :  { %507 = vrot.lane.b32.xlu1 %v412_v7, %s784_s4  ;;  %518 = vrot.lane.b32.xlu0 %v412_v7, %s781_s26 }
  0xe0   :  { %v679_v8 = vpop.f32.mrf.mxu0 }
  0xe2   :  { %v747_v10 = vpop.eup %746 }
  0xe3   :  { %v308_v11 = vadd.f32 1.0, %v747_v10  ;;  %529 = vrot.lane.b32.xlu1 %v412_v7, %s785_s5 }
  0xe4   :  { %v749_v14 = vpop.eup %748 }
  0xe5   :  { %750 = vrcp.f32 %v308_v11  ;;  %v315_v16 = vadd.f32 1.0, %v749_v14 }
  0xe7   :  { %752 = vrcp.f32 %v315_v16 }
  0xf2   :  { %v751_v19 = vpop.eup %750 }
  0xf3   :  { %v318_v20 = vmul.f32 %v751_v19, %v299_v17 }
  0xf4   :  { %v753_v27 = vpop.eup %752 }
  0xf5   :  { %v319_v21 = vadd.f32 %v318_v20, %v157_v18  ;;  %v336_v29 = vsub.f32 1.0, %v753_v27  ;;  %v338_v32 = vmul.f32 %v753_v27, %v335_v28 }
  0xf7   :  { %754 = vtanh.f32 %v319_v21 }
 0x104   :  { %v755_v30 = vpop.eup %754 }
 0x105   :  { %v337_v31 = vmul.f32 %v755_v30, %v336_v29 }
 0x107   :  { %v998_v33 = vadd.f32 %v338_v32, %v337_v31 }
 0x109   :  { %713 = vmatmul.mubr.f32.vlgmr.msra.gmra.mxu1 %v998_v33 }
 0x151   :  { %v508_v34 = vpop.permute.xlu1 %507  ;;  %v519_v35 = vpop.permute.xlu0 %518 }
 0x155   :  { %v530_v38 = vpop.permute.xlu1 %529 }
 0x1c9   :  { %v498_v36 = vpop.f32.mrf.mxu1 }
 0x1ca   :  { %v521_v37 = vmul.f32 %v519_v35, %v498_v36  ;;  %v510_v9 = vmul.f32 %v508_v34, %v498_v36  ;;  %v532_v40 = vmul.f32 %v530_v38, %v498_v36  ;;  %v502_v41 = vmul.f32 %v498_v36, %v412_v7 }
 0x1cb   :  { %v714_v39 = vpop.f32.mrf.mxu1 }
 0x1cc   :  { %523 = vrot.lane.b32.xlu1 %v521_v37, %s782_s27  ;;  %512 = vrot.lane.b32.xlu0 %v510_v9, %s786_s7  ;;  %v503_v42 = vsel %vm77_vm0, %v502_v41, 0.0 }
 0x1d0   :  { %534 = vrot.lane.b32.xlu0 %v532_v40, %s787_s15 }
 0x1f0   :  { %504 = vadd.xlane.f32.xlu1 %v503_v42 }
 0x23e   :  { %v513_v43 = vpop.permute.xlu0 %512  ;;  %v524_v45 = vpop.permute.xlu1 %523 }
 0x23f   :  { %v515_v44 = vsel %vm77_vm0, %v513_v43, 0.0  ;;  %v526_v47 = vsel %vm77_vm0, %v524_v45, 0.0 }
 0x240   :  { %516 = vadd.xlane.f32.xlu0 %v515_v44 }
 0x242   :  { %v535_v46 = vpop.permute.xlu0 %534 }
 0x243   :  { %v537_v48 = vsel %vm77_vm0, %v535_v46, 0.0 }
 0x244   :  { %527 = vadd.xlane.f32.xlu0 %v526_v47  ;;  %538 = vadd.xlane.f32.xlu1 %v537_v48 }
 0x279   :  { %v505_v49 = vpop.xlane.xlu1 %504 }
 0x2c9   :  { %v517_v50 = vpop.xlane.xlu0 %516 }
 0x2ca   :  { %v541_v51 = vsel %vm540_vm5, %v505_v49, %v517_v50 }
 0x2cd   :  { %v528_v52 = vpop.xlane.xlu0 %527  ;;  %v539_v53 = vpop.xlane.xlu1 %538 }
 0x2ce   :  { %v543_v55 = vsel %vm542_vm6, %v541_v51, %v528_v52 }
 0x2cf   :  { %v545_v56 = vsel %vm544_vm7, %v543_v55, %v539_v53 }
 0x2d0   :  { %v547_v57 = vadd.f32 %v546_v54, %v545_v56 }
 0x2d2   :  { %v549_v58 = vsel %vm548_vm8, %v547_v57, -inf }
 0x2d3   :  { %550 = vmax.xlane.f32.xlu0 %v549_v58 }
 0x35c   :  { %v551_v61 = vpop.xlane.xlu0 %550 }
 0x35d   :  { %vm552_vm9 = vcmp.ge.f32.partialorder %v547_v57, %v551_v61 }
 0x35e   :  { %v627_v62 = vsel %vm552_vm9, 1.0, %v779_v6 }
 0x35f   :  { %555 = vst.msk [vmem:[%s1035_s10] sm:$0xff] %vm548_vm8, %v627_v62  ;;  %573 = vperm.xlu0 %730, %v627_v62   ;;  %563 = vperm.xlu1 %729, %v627_v62   ;;  %s599_s10 = sshll.u32 %s791_s8, 4  ;;  %s600_s10 = int_to_ptr.vmem [resolvable:$true] %s599_s10 }
 0x360   :  { %p761_p1 = scmp.lt.s32.totalorder %s600_s10, %s600_s10 }
 0x363   :  { %731 = vset.pattern.permute.xlu1 %v790_v63  ;;  %733 = vset.pattern.permute.xlu0 %v790_v63 }
 0x364   :  { %583 = vperm.xlu1 %731, %v627_v62  }
 0x368   :  { %732 = vset.pattern.permute.xlu1 %v778_v2 }
 0x369   :  { %558 = vperm.xlu1 %732, %v627_v62  }
 0x3da   :  { %v564_v0 = vpop.permute.xlu1 %563  ;;  %v574_v3 = vpop.permute.xlu0 %573 }
 0x3db   :  { %v566_v1 = vmul.f32 %v564_v0, %v998_v33  ;;  %v576_v6 = vmul.f32 %v574_v3, %v998_v33 }
 0x3dd   :  { %568 = vrot.lane.b32.xlu1 %v566_v1, %s782_s27  ;;  %s756_s27 = scalar_lea.vmem %s600_s10, 128 }
 0x3de   :  { %p757_p0 = scmp.ne.s32.totalorder %s600_s10, %s756_s27  ;;  %p762_p2 = scmp.lt.s32.totalorder %s756_s27, %s756_s27 }
 0x3df   :  { %v584_v4 = vpop.permute.xlu1 %583 }
 0x3e0   :  { %v586_v5 = vmul.f32 %v584_v4, %v998_v33  ;;  %p763_p3 = por %p762_p2, %p761_p1 }
 0x3e1   :  { %578 = vrot.lane.b32.xlu1 %v576_v6, %s783_s11 }
 0x3e2   :  { %p764_p4 = pnand %p763_p3, %p757_p0 }
 0x3e4   :  { %v559_v7 = vpop.permute.xlu1 %558 }
 0x3e5   :  { %588 = vrot.lane.b32.xlu1 %v586_v5, %s781_s26  ;;  %v561_v2 = vmul.f32 %v559_v7, %v998_v33 }
 0x44f   :  { %v569_v8 = vpop.permute.xlu1 %568 }
 0x450   :  { %v571_v11 = vadd.f32 %v569_v8, %v561_v2 }
 0x453   :  { %v579_v10 = vpop.permute.xlu1 %578 }
 0x454   :  { %v581_v12 = vadd.f32 %v579_v10, %v571_v11 }
 0x457   :  { %v589_v13 = vpop.permute.xlu1 %588 }
 0x458   :  { %v591_v14 = vadd.f32 %v589_v13, %v581_v12 }
 0x45a   :  { %592 = vst.msk [vmem:[#allocation2] sm:$0xff] %vm219_vm2, %v591_v14 }
 0x45b   :  { %767 = shalt.err (!%p764_p4)
}
 0x45c   :  { %602 = dma.vmem_to_hbm [thread:$0]  %s600_s10, 128, %s1034_s9, [#allocation3]  }
 0x45d   :  { %776 = dma.done.wait [#allocation3], 128  }
 0x45e   :  { %777 = vsyncadd [#allocation3], 4294967168 }
 0x45f   :  { %610 = vsyncpa [#allocation3], 1 }

</bundles_post_ra>
